<compile_context>
chip_gen: v7x
topology: tpu7x:2x2x1
jax: 0.10.0
libtpu: 0.0.40
codegen_flags: <defaults>
</compile_context>

<pallas_src>
import jax
import jax.numpy as jnp
from jax import lax
from jax.experimental import pallas as pl
from jax.experimental.pallas import tpu as pltpu


def make_tcn_kernel(T, H):
    """Kernel closure over static sequence length T and hidden size H."""

    def tcn_kernel(x_ref, w1d_ref, w2_ref, wdec_ref, bias_ref, y_ref, ymax_ref):
        x = x_ref[...]                                   # (Mb, E), rows = batch*time
        Mb = x.shape[0]
        Fp = y_ref.shape[1]                              # padded decoder width (128)

        biases = bias_ref[...]                           # (3, P) packed slab
        b1d = biases[0:1, :2 * H]                        # [b1 | bd] for fused conv1+downsample
        b2 = biases[1:2, :H]
        bdec = biases[2:3, :Fp]

        # One (Mb,1) first-timestep mask, shared by both causal shifts.
        # Rows where (row % T == 0) are t=0 of a sequence -> causal left-pad is zero.
        row = lax.broadcasted_iota(jnp.int32, (Mb, 1), 0)
        is_t0 = (row % T) == 0

        # --- conv1 (weight-normed, k=2, dilation=1, chomp) fused with the residual
        #     1x1 downsample conv in a single (Mb, 2E) @ (2E, 2H) matmul.
        x_prev = jnp.where(is_t0, 0.0, pltpu.roll(x, shift=1, axis=0))
        xin = jnp.concatenate([x_prev, x], axis=-1)      # (Mb, 2E)
        h1res = jnp.dot(xin, w1d_ref[...], preferred_element_type=jnp.float32) + b1d
        h1 = jnp.maximum(h1res[:, :H], 0.0)              # conv1 -> ReLU (dropout = identity)
        res = h1res[:, H:2 * H]                          # downsample(x), no ReLU here

        # --- conv2 (weight-normed, k=2, dilation=1, chomp) + ReLU (dropout = identity)
        h1_prev = jnp.where(is_t0, 0.0, pltpu.roll(h1, shift=1, axis=0))
        hin = jnp.concatenate([h1_prev, h1], axis=-1)    # (Mb, 2H)
        h2 = jnp.dot(hin, w2_ref[...], preferred_element_type=jnp.float32) + b2
        h2 = jnp.maximum(h2, 0.0)

        # --- residual add + final ReLU
        h = jnp.maximum(h2 + res, 0.0)

        # --- decoder Linear(hidden -> word_f), padded to Fp=128 lanes (lane-dense store)
        y = jnp.dot(h, wdec_ref[...], preferred_element_type=jnp.float32) + bdec
        y_ref[...] = y.astype(y_ref.dtype)

        # --- torch.max(y, dim=1): per-sequence time max, lane-dense (Mb/T, Fp) output.
        ymax_ref[...] = jnp.max(y.reshape(Mb // T, T, Fp), axis=1).astype(ymax_ref.dtype)

    return tcn_kernel


def _default_num_row_blocks(M, T):
    """Split rows across the 2 TensorCores only on v7x and only once per-core
    compute clearly exceeds the ~0.35us per-step fixed cost."""
    try:
        kind = jax.devices()[0].device_kind.lower()
    except Exception:
        return 1
    if (
        "v7" in kind
        and M >= 4096
        and M % (2 * T) == 0
        and (M // 2) % 8 == 0
        and (M // (2 * T)) % 8 == 0
    ):
        return 2
    return 1


def text_encoder_tcn(x, p, num_row_blocks=None):
    """x: (B, T, embed) f32.  Returns (y: (B, T, word_f), y_max: (B, word_f))."""
    B, T, E = x.shape
    H = p["w2"].shape[1]
    Fp = p["wdec"].shape[1]          # lane-padded decoder width (multiple of 128)
    F = p["word_f"]
    M = B * T
    assert p["w1d"].shape == (2 * E, 2 * H)

    if num_row_blocks is None:
        num_row_blocks = _default_num_row_blocks(M, T)
    G = num_row_blocks
    assert M % G == 0 and (M // G) % T == 0, "row blocks must align to sequence length"
    Mb = M // G
    Bb = Mb // T                      # sequences per block (rows of the ymax output block)
    assert G == 1 or Bb % 8 == 0, "multi-block ymax output needs 8-row alignment"

    x2d = x.reshape(M, E)
    const = lambda g: (0, 0)          # weights/biases: same block every step

    y2d, ymax_pad = pl.pallas_call(
        make_tcn_kernel(T, H),
        out_shape=(
            jax.ShapeDtypeStruct((M, Fp), jnp.float32),
            jax.ShapeDtypeStruct((B, Fp), jnp.float32),
        ),
        grid_spec=pltpu.PrefetchScalarGridSpec(
            num_scalar_prefetch=0,
            grid=(G,),
            in_specs=[
                pl.BlockSpec((Mb, E), lambda g: (g, 0)),      # x rows
                pl.BlockSpec(p["w1d"].shape, const),          # conv1 taps + downsample, stacked
                pl.BlockSpec(p["w2"].shape, const),           # conv2 taps, stacked
                pl.BlockSpec(p["wdec"].shape, const),         # decoder weight (lane-padded)
                pl.BlockSpec(p["bias"].shape, const),         # packed biases (3, P)
            ],
            out_specs=[
                pl.BlockSpec((Mb, Fp), lambda g: (g, 0)),     # y rows (lane-dense)
                pl.BlockSpec((Bb, Fp), lambda g: (g, 0)),     # per-sequence time max
            ],
        ),
        compiler_params=pltpu.CompilerParams(dimension_semantics=("parallel",)),
    )(x2d, p["w1d"], p["w2"], p["wdec"], p["bias"])

    y = y2d[:, :F].reshape(B, T, F)
    y_max = ymax_pad[:, :F]
    return y, y_max


def init_params(key, embed, hidden, word_f, kernel_size=2):
    """Deterministic synthetic parameters matching the module's shapes (packed)."""
    ks = jax.random.split(key, 8)

    def weight_norm_conv_weight(k, out_c, in_c, ksz):
        # v ~ N(0, 0.01); g initialized to ||v|| per out channel (torch weight_norm init)
        v = 0.01 * jax.random.normal(k, (out_c, in_c, ksz), jnp.float32)
        norm = jnp.sqrt(jnp.sum(v * v, axis=(1, 2), keepdims=True)) + 1e-12
        g = norm
        return g * v / norm                                  # effective weight (out, in, k)

    w1 = weight_norm_conv_weight(ks[0], hidden, embed, kernel_size)   # (H, E, 2)
    w2 = weight_norm_conv_weight(ks[1], hidden, hidden, kernel_size)  # (H, H, 2)
    wd = 0.01 * jax.random.normal(ks[2], (hidden, embed, 1), jnp.float32)
    b1 = 0.01 * jax.random.normal(ks[3], (hidden,), jnp.float32)
    b2 = 0.01 * jax.random.normal(ks[4], (hidden,), jnp.float32)
    bd = 0.01 * jax.random.normal(ks[5], (hidden,), jnp.float32)
    wdec = 0.01 * jax.random.normal(ks[6], (word_f, hidden), jnp.float32)
    bdec = jnp.zeros((word_f,), jnp.float32)                          # decoder.bias.fill_(0)

    # Fused conv1 + residual-downsample weight block (2E, 2H):
    #   [ w1_tap0 | 0  ]
    #   [ w1_tap1 | wd ]
    w1_tap0 = w1[:, :, 0].T                                   # (E, H)
    w1_tap1 = w1[:, :, 1].T                                   # (E, H)
    wd_mat = wd[:, :, 0].T                                    # (E, H)
    zeros_eh = jnp.zeros((embed, hidden), jnp.float32)
    w1d = jnp.concatenate(
        [jnp.concatenate([w1_tap0, zeros_eh], axis=1),
         jnp.concatenate([w1_tap1, wd_mat], axis=1)], axis=0)          # (2E, 2H)

    # Fused per-tap conv2 weights: [h1[t-1], h1[t]] @ [[W_tap0],[W_tap1]]
    w2_packed = jnp.concatenate([w2[:, :, 0].T, w2[:, :, 1].T], axis=0)  # (2H, H)

    # Decoder weight lane-padded to a multiple of 128 (padded columns are ZERO so the
    # padded y lanes are exactly 0 and never leak into the in-kernel time-max).
    Fp = max(128, ((word_f + 127) // 128) * 128)
    wdec_packed = jnp.pad(wdec.T, ((0, 0), (0, Fp - word_f)))            # (H, Fp)

    # Packed bias slab: rows [ (b1|bd), b2, bdec ], lane-padded to P = max(2H, Fp).
    P = max(2 * hidden, Fp)
    pad = lambda v: jnp.pad(v, (0, P - v.shape[0]))
    bias = jnp.stack(
        [pad(jnp.concatenate([b1, bd])), pad(b2), pad(bdec)], axis=0)    # (3, P)

    return {
        "w1d": w1d,                          # (2E, 2H)  conv1 taps + downsample
        "w2": w2_packed,                     # (2H, H)   conv2 taps
        "wdec": wdec_packed,                 # (H, Fp)   decoder, lane-padded
        "bias": bias,                        # (3, P)
        "word_f": word_f,                    # logical decoder width
    }


def ref_forward(x, p):
    """Pure-JAX reference mirroring the PyTorch forward (inference, dropout off)."""
    E = x.shape[-1]
    H = p["w2"].shape[1]
    F = p["word_f"]
    w1_tap0 = p["w1d"][:E, :H]
    w1_tap1 = p["w1d"][E:, :H]
    wd = p["w1d"][E:, H:2 * H]
    w2_tap0 = p["w2"][:H]
    w2_tap1 = p["w2"][H:]
    wdec = p["wdec"][:, :F]
    b1 = p["bias"][0, :H]
    bd = p["bias"][0, H:2 * H]
    b2 = p["bias"][1, :H]
    bdec = p["bias"][2, :F]

    def shift(a):
        return jnp.concatenate([jnp.zeros_like(a[:, :1]), a[:, :-1]], axis=1)

    h1 = jax.nn.relu(shift(x) @ w1_tap0 + x @ w1_tap1 + b1)
    h2 = jax.nn.relu(shift(h1) @ w2_tap0 + h1 @ w2_tap1 + b2)
    res = x @ wd + bd
    h = jax.nn.relu(h2 + res)
    y = h @ wdec + bdec
    return y, jnp.max(y, axis=1)


if __name__ == "__main__":
    # TODO(synk): Dropout(0.3)/Dropout(0.1) layers are identity here (inference mode).
    B, T, EMBED, HIDDEN, WORD_F = 2, 16, 32, 64, 16

    key = jax.random.PRNGKey(0)
    kx, kp = jax.random.split(key)
    x = jax.random.normal(kx, (B, T, EMBED), jnp.float32)
    params = init_params(kp, EMBED, HIDDEN, WORD_F)

    y, y_max = text_encoder_tcn(x, params)
    jax.block_until_ready((y, y_max))

    y_ref, y_max_ref = ref_forward(x, params)
    assert y.shape == (B, T, WORD_F) and y_max.shape == (B, WORD_F)
    assert jnp.allclose(y, y_ref, atol=1e-5, rtol=1e-5)
    assert jnp.allclose(y_max, y_max_ref, atol=1e-5, rtol=1e-5)

    print("KERNEL_OK")
</pallas_src>

<mosaic_0001>
module attributes {stable_mosaic.version = 11 : i64} {
  func.func @tcn_kernel(%arg0: i32, %arg1: memref<32x32xf32, #tpu.memory_space<vmem>>, %arg2: memref<64x128xf32, #tpu.memory_space<vmem>>, %arg3: memref<128x64xf32, #tpu.memory_space<vmem>>, %arg4: memref<64x128xf32, #tpu.memory_space<vmem>>, %arg5: memref<3x128xf32, #tpu.memory_space<vmem>>, %arg6: memref<32x128xf32, #tpu.memory_space<vmem>>, %arg7: memref<2x128xf32, #tpu.memory_space<vmem>>) attributes {dimension_semantics = [#tpu.dimension_semantics<parallel>], iteration_bounds = array<i64: 1>, scalar_prefetch = 0 : i64, scratch_operands = 0 : i64, tpu.core_type = #tpu.core_type<tc>, window_params = [{transform_indices = @transform_0, window_bounds = array<i64: 32, 32>}, {pipeline_mode = #tpu.pipeline_mode<synchronous>, transform_indices = @transform_1, window_bounds = array<i64: 64, 128>}, {pipeline_mode = #tpu.pipeline_mode<synchronous>, transform_indices = @transform_2, window_bounds = array<i64: 128, 64>}, {pipeline_mode = #tpu.pipeline_mode<synchronous>, transform_indices = @transform_3, window_bounds = array<i64: 64, 128>}, {pipeline_mode = #tpu.pipeline_mode<synchronous>, transform_indices = @transform_4, window_bounds = array<i64: 3, 128>}, {transform_indices = @transform_5, window_bounds = array<i64: 32, 128>}, {transform_indices = @transform_6, window_bounds = array<i64: 2, 128>}]} {
    %c0 = arith.constant 0 : index
    %c0_0 = arith.constant 0 : index
    %0 = vector.load %arg1[%c0, %c0_0] : memref<32x32xf32, #tpu.memory_space<vmem>>, vector<32x32xf32>
    %c0_1 = arith.constant 0 : index
    %c0_2 = arith.constant 0 : index
    %1 = vector.load %arg5[%c0_1, %c0_2] : memref<3x128xf32, #tpu.memory_space<vmem>>, vector<3x128xf32>
    %2 = vector.extract_strided_slice %1 {offsets = [0, 0], sizes = [1, 128], strides = [1, 1]} : vector<3x128xf32> to vector<1x128xf32>
    %3 = vector.extract_strided_slice %1 {offsets = [1, 0], sizes = [1, 64], strides = [1, 1]} : vector<3x128xf32> to vector<1x64xf32>
    %4 = vector.extract_strided_slice %1 {offsets = [2, 0], sizes = [1, 128], strides = [1, 1]} : vector<3x128xf32> to vector<1x128xf32>
    %5 = tpu.iota {dimensions = array<i32: 0>} : vector<32x1xi32>
    %c16_i32 = arith.constant 16 : i32
    %c0_i32 = arith.constant 0 : i32
    %6 = arith.cmpi eq, %c16_i32, %c0_i32 : i32
    %c1_i32 = arith.constant 1 : i32
    %7 = arith.select %6, %c1_i32, %c16_i32 : i32
    %8 = vector.broadcast %7 : i32 to vector<32x1xi32>
    %9 = arith.remsi %5, %8 : vector<32x1xi32>
    %c0_i32_3 = arith.constant 0 : i32
    %10 = vector.broadcast %c0_i32_3 : i32 to vector<32x1xi32>
    %11 = arith.cmpi ne, %9, %10 : vector<32x1xi32>
    %c0_i32_4 = arith.constant 0 : i32
    %12 = vector.broadcast %c0_i32_4 : i32 to vector<32x1xi32>
    %13 = arith.cmpi slt, %9, %12 : vector<32x1xi32>
    %c0_i32_5 = arith.constant 0 : i32
    %14 = arith.cmpi slt, %7, %c0_i32_5 : i32
    %15 = vector.broadcast %14 : i1 to vector<32x1xi1>
    %16 = vector.broadcast %15 : vector<32x1xi1> to vector<32x1xi1>
    %17 = arith.xori %13, %16 : vector<32x1xi1>
    %18 = arith.andi %17, %11 : vector<32x1xi1>
    %19 = vector.broadcast %7 : i32 to vector<32x1xi32>
    %20 = arith.addi %9, %19 : vector<32x1xi32>
    %21 = arith.select %18, %20, %9 : vector<32x1xi1>, vector<32x1xi32>
    %c0_i32_6 = arith.constant 0 : i32
    %22 = vector.broadcast %c0_i32_6 : i32 to vector<32x1xi32>
    %23 = arith.cmpi eq, %21, %22 : vector<32x1xi32>
    %c1_i32_7 = arith.constant 1 : i32
    %24 = tpu.dynamic_rotate %0 by %c1_i32_7 dim 0 : vector<32x32xf32>, i32 -> vector<32x32xf32>
    %cst = arith.constant 0.000000e+00 : f32
    %25 = vector.shape_cast %23 : vector<32x1xi1> to vector<32x1xi1>
    %26 = vector.broadcast %25 : vector<32x1xi1> to vector<32x32xi1>
    %27 = vector.broadcast %cst : f32 to vector<32x32xf32>
    %28 = arith.select %26, %27, %24 : vector<32x32xi1>, vector<32x32xf32>
    %29 = tpu.concatenate %28, %0 in 1 : vector<32x32xf32>, vector<32x32xf32> -> vector<32x64xf32>
    %c0_8 = arith.constant 0 : index
    %c0_9 = arith.constant 0 : index
    %30 = vector.load %arg2[%c0_8, %c0_9] : memref<64x128xf32, #tpu.memory_space<vmem>>, vector<64x128xf32>
    %cst_10 = arith.constant dense<0.000000e+00> : vector<32x128xf32>
    %31 = tpu.matmul %29, %30, %cst_10 {dimension_numbers = #tpu.dot_dimension_numbers<[1], [0], [0], [1], [0, 0, 1, 1], [], []>} : vector<32x64xf32>, vector<64x128xf32>, vector<32x128xf32> -> vector<32x128xf32>
    %32 = vector.broadcast %2 : vector<1x128xf32> to vector<32x128xf32>
    %33 = arith.addf %31, %32 : vector<32x128xf32>
    %34 = vector.extract_strided_slice %33 {offsets = [0, 0], sizes = [32, 64], strides = [1, 1]} : vector<32x128xf32> to vector<32x64xf32>
    %cst_11 = arith.constant 0.000000e+00 : f32
    %35 = vector.broadcast %cst_11 : f32 to vector<32x64xf32>
    %36 = arith.maximumf %34, %35 : vector<32x64xf32>
    %37 = vector.extract_strided_slice %33 {offsets = [0, 64], sizes = [32, 64], strides = [1, 1]} : vector<32x128xf32> to vector<32x64xf32>
    %c1_i32_12 = arith.constant 1 : i32
    %38 = tpu.dynamic_rotate %36 by %c1_i32_12 dim 0 : vector<32x64xf32>, i32 -> vector<32x64xf32>
    %cst_13 = arith.constant 0.000000e+00 : f32
    %39 = vector.shape_cast %23 : vector<32x1xi1> to vector<32x1xi1>
    %40 = vector.broadcast %39 : vector<32x1xi1> to vector<32x64xi1>
    %41 = vector.broadcast %cst_13 : f32 to vector<32x64xf32>
    %42 = arith.select %40, %41, %38 : vector<32x64xi1>, vector<32x64xf32>
    %43 = tpu.concatenate %42, %36 in 1 : vector<32x64xf32>, vector<32x64xf32> -> vector<32x128xf32>
    %c0_14 = arith.constant 0 : index
    %c0_15 = arith.constant 0 : index
    %44 = vector.load %arg3[%c0_14, %c0_15] : memref<128x64xf32, #tpu.memory_space<vmem>>, vector<128x64xf32>
    %cst_16 = arith.constant dense<0.000000e+00> : vector<32x64xf32>
    %45 = tpu.matmul %43, %44, %cst_16 {dimension_numbers = #tpu.dot_dimension_numbers<[1], [0], [0], [1], [0, 0, 1, 1], [], []>} : vector<32x128xf32>, vector<128x64xf32>, vector<32x64xf32> -> vector<32x64xf32>
    %46 = vector.broadcast %3 : vector<1x64xf32> to vector<32x64xf32>
    %47 = arith.addf %45, %46 : vector<32x64xf32>
    %cst_17 = arith.constant 0.000000e+00 : f32
    %48 = vector.broadcast %cst_17 : f32 to vector<32x64xf32>
    %49 = arith.maximumf %47, %48 : vector<32x64xf32>
    %50 = arith.addf %49, %37 : vector<32x64xf32>
    %cst_18 = arith.constant 0.000000e+00 : f32
    %51 = vector.broadcast %cst_18 : f32 to vector<32x64xf32>
    %52 = arith.maximumf %50, %51 : vector<32x64xf32>
    %c0_19 = arith.constant 0 : index
    %c0_20 = arith.constant 0 : index
    %53 = vector.load %arg4[%c0_19, %c0_20] : memref<64x128xf32, #tpu.memory_space<vmem>>, vector<64x128xf32>
    %cst_21 = arith.constant dense<0.000000e+00> : vector<32x128xf32>
    %54 = tpu.matmul %52, %53, %cst_21 {dimension_numbers = #tpu.dot_dimension_numbers<[1], [0], [0], [1], [0, 0, 1, 1], [], []>} : vector<32x64xf32>, vector<64x128xf32>, vector<32x128xf32> -> vector<32x128xf32>
    %55 = vector.broadcast %4 : vector<1x128xf32> to vector<32x128xf32>
    %56 = arith.addf %54, %55 : vector<32x128xf32>
    %c0_22 = arith.constant 0 : index
    %c0_23 = arith.constant 0 : index
    %57 = vector.load %arg6[%c0_22, %c0_23] : memref<32x128xf32, #tpu.memory_space<vmem>>, vector<32x128xf32>
    tpu.vector_store %arg6[%c0_22, %c0_23], %56 {strides = array<i32>} : memref<32x128xf32, #tpu.memory_space<vmem>>, vector<32x128xf32>,
    %58 = vector.shape_cast %56 : vector<32x128xf32> to vector<2x16x128xf32>
    %cst_24 = arith.constant dense<0xFF800000> : vector<2x128xf32>
    %59 = vector.multi_reduction <maximumf>, %58, %cst_24 [1] : vector<2x16x128xf32> to vector<2x128xf32>
    %c0_25 = arith.constant 0 : index
    %c0_26 = arith.constant 0 : index
    %60 = vector.load %arg7[%c0_25, %c0_26] : memref<2x128xf32, #tpu.memory_space<vmem>>, vector<2x128xf32>
    tpu.vector_store %arg7[%c0_25, %c0_26], %59 {strides = array<i32>} : memref<2x128xf32, #tpu.memory_space<vmem>>, vector<2x128xf32>,
    return
  }
  func.func @transform_0(%arg0: i32) -> (i32, i32) {
    %c0_i32 = arith.constant 0 : i32
    %c0_i32_0 = arith.constant 0 : i32
    return %arg0, %c0_i32 : i32, i32
  }
  func.func @transform_1(%arg0: i32) -> (i32, i32) {
    %c0_i32 = arith.constant 0 : i32
    %c0_i32_0 = arith.constant 0 : i32
    %c0_i32_1 = arith.constant 0 : i32
    return %c0_i32, %c0_i32_0 : i32, i32
  }
  func.func @transform_2(%arg0: i32) -> (i32, i32) {
    %c0_i32 = arith.constant 0 : i32
    %c0_i32_0 = arith.constant 0 : i32
    %c0_i32_1 = arith.constant 0 : i32
    return %c0_i32, %c0_i32_0 : i32, i32
  }
  func.func @transform_3(%arg0: i32) -> (i32, i32) {
    %c0_i32 = arith.constant 0 : i32
    %c0_i32_0 = arith.constant 0 : i32
    %c0_i32_1 = arith.constant 0 : i32
    return %c0_i32, %c0_i32_0 : i32, i32
  }
  func.func @transform_4(%arg0: i32) -> (i32, i32) {
    %c0_i32 = arith.constant 0 : i32
    %c0_i32_0 = arith.constant 0 : i32
    %c0_i32_1 = arith.constant 0 : i32
    return %c0_i32, %c0_i32_0 : i32, i32
  }
  func.func @transform_5(%arg0: i32) -> (i32, i32) {
    %c0_i32 = arith.constant 0 : i32
    %c0_i32_0 = arith.constant 0 : i32
    return %arg0, %c0_i32 : i32, i32
  }
  func.func @transform_6(%arg0: i32) -> (i32, i32) {
    %c0_i32 = arith.constant 0 : i32
    %c0_i32_0 = arith.constant 0 : i32
    return %arg0, %c0_i32 : i32, i32
  }
}

</mosaic_0001>

<bundles_post_ra>
// kernel: tpu_custom_call.1
= control target key start
LH: loop header
LB: loop body
LE: loop exit
PB: predicated region body
PF: predicated region fallthrough
CT: control target
= control target key end

     0   :  { %12 = vsyncpa [#allocation3], 0  ;;  %v29_v3 = vlaneseq  ;;  %s832_s27 = smov 32   ;;  %s1065_s0 = inlined_call_operand.vmem [shape: f32[32,32], index: 0, kind: input, shape index: {}]   ;;  %s1066_s1 = inlined_call_operand.vmem [shape: f32[64,128], index: 1, kind: input, shape index: {}]   ;;  %s1067_s2 = inlined_call_operand.vmem [shape: f32[128,64], index: 2, kind: input, shape index: {}]   ;;  %s1068_s3 = inlined_call_operand.vmem [shape: f32[64,128], index: 3, kind: input, shape index: {}]   ;;  %s1069_s4 = inlined_call_operand.vmem [shape: f32[3,128], index: 4, kind: input, shape index: {}]   ;;  %s1070_s5 = inlined_call_operand.hbm [shape: f32[32,128], index: 5, kind: output, shape index: {0}]   ;;  %s1071_s6 = inlined_call_operand.hbm [shape: f32[2,128], index: 6, kind: output, shape index: {1}]  }
   0x1   :  { %v24_v0 = vld [vmem:[%s1065_s0] sm:$0xff]  ;;  %v26_v1 = vld [vmem:[%s1065_s0 + $0x10] sm:$0xff]  ;;  %v25_v2 = vld [vmem:[%s1065_s0 + $0x8] sm:$0xff] }
   0x2   :  { %111 = vrot.lane.b32.xlu0 %v24_v0, %s832_s27  ;;  %v86_v4 = vrot.slane %v24_v0, 7  ;;  %115 = vrot.lane.b32.xlu1 %v26_v1, %s832_s27  ;;  %v88_v5 = vrot.slane %v26_v1, 7  ;;  %v87_v6 = vrot.slane %v25_v2, 7  ;;  %v27_v7 = vld [vmem:[%s1065_s0 + $0x18] sm:$0xff]  ;;  %v128_v8 = vld [vmem:[%s1066_s1] sm:$0xff]  ;;  %v897_v13 = vshrl.u32 %v29_v3, 7 }
   0x3   :  { %v89_v9 = vrot.slane %v27_v7, 7  ;;  %v129_v10 = vld [vmem:[%s1066_s1 + $0x8] sm:$0xff]  ;;  %v130_v11 = vld [vmem:[%s1066_s1 + $0x10] sm:$0xff]  ;;  %v131_v12 = vld [vmem:[%s1066_s1 + $0x18] sm:$0xff] }
   0x4   :  { %v704_v14 = vpack.c.bf16 %v129_v10, %v128_v8  ;;  %v708_v15 = vpack.c.bf16 %v131_v12, %v130_v11  ;;  %v132_v16 = vld [vmem:[%s1066_s1 + $0x20] sm:$0xff]  ;;  %vm90_vm0 = vcmp.lt.s32.totalorder %v897_v13, 1  ;;  %v133_v17 = vld [vmem:[%s1066_s1 + $0x28] sm:$0xff] }
   0x5   :  { %v94_v18 = vsel %vm90_vm0, %v89_v9, %v86_v4  ;;  %v92_v19 = vsel %vm90_vm0, %v87_v6, %v88_v5 }
   0x6   :  { %113 = vrot.lane.b32.xlu0 %v25_v2, %s832_s27  ;;  %117 = vrot.lane.b32.xlu1 %v27_v7, %s832_s27 }
   0x7   :  { %13 = vsyncpa [#allocation5], 0  ;;  %705 = vmatprep.subr.bf16.mxu0 %v704_v14  ;;  %v93_v20 = vsel %vm90_vm0, %v86_v4, %v87_v6  ;;  %v91_v21 = vsel %vm90_vm0, %v88_v5, %v89_v9  ;;  %v712_v22 = vpack.c.bf16 %v133_v17, %v132_v16  ;;  %v134_v23 = vld [vmem:[%s1066_s1 + $0x30] sm:$0xff]  ;;  %v135_v24 = vld [vmem:[%s1066_s1 + $0x38] sm:$0xff]  ;;  %v32_v26 = vadd.s32 16, %v897_v13  ;;  %s833_s10 = smov 64  }
   0x8   :  { %707 = vmatpush3.bf16.msra.mxu0 %v704_v14  ;;  %v716_v25 = vpack.c.bf16 %v135_v24, %v134_v23  ;;  %v38_v27 = vand.u32 15, %v897_v13  ;;  %vm123_vm2 = vcmask 261120   ;;  %vm140_vm4 = vcmask 523264   ;;  %v274_v41 = vld [vmem:[%s1067_s2] sm:$0xff]  ;;  %v275_v42 = vld [vmem:[%s1067_s2 + $0x8] sm:$0xff]  ;;  %v276_v43 = vld [vmem:[%s1067_s2 + $0x10] sm:$0xff] }
   0x9   :  { %709 = vmatprep.subr.bf16.mxu0 %v708_v15  ;;  %v52_v28 = vand.u32 15, %v32_v26  ;;  %v720_v44 = vpack.c.bf16 %v275_v42, %v274_v41  ;;  %v277_v45 = vld [vmem:[%s1067_s2 + $0x18] sm:$0xff]  ;;  %v278_v47 = vld [vmem:[%s1067_s2 + $0x20] sm:$0xff]  ;;  %v279_v48 = vld [vmem:[%s1067_s2 + $0x28] sm:$0xff]  ;;  %v138_v0 = vsub.s32 0, %v897_v13 }
   0xa   :  { %vm922_vm1 = vcmp.eq.s32.totalorder %v38_v27, 0  ;;  %v724_v46 = vpack.c.bf16 %v277_v45, %v276_v43  ;;  %v728_v49 = vpack.c.bf16 %v279_v48, %v278_v47  ;;  %v280_v50 = vld [vmem:[%s1067_s2 + $0x30] sm:$0xff]  ;;  %v281_v51 = vld [vmem:[%s1067_s2 + $0x38] sm:$0xff]  ;;  %v282_v53 = vld [vmem:[%s1067_s2 + $0x40] sm:$0xff] }
   0xb   :  { %v103_v30 = vsel %vm922_vm1, 0.0, %v94_v18  ;;  %vm928_vm3 = vcmp.eq.s32.totalorder %v52_v28, 0  ;;  %721 = vmatprep.subr.bf16.mxu1 %v720_v44  ;;  %v732_v52 = vpack.c.bf16 %v281_v51, %v280_v50  ;;  %v283_v54 = vld [vmem:[%s1067_s2 + $0x48] sm:$0xff]  ;;  %v284_v56 = vld [vmem:[%s1067_s2 + $0x50] sm:$0xff]  ;;  %v285_v57 = vld [vmem:[%s1067_s2 + $0x58] sm:$0xff]  ;;  %v292_v51 = vsub.s32 1, %v897_v13 }
   0xc   :  { %711 = vmatpush3.bf16.msra.mxu0 %v708_v15  ;;  %v105_v35 = vsel %vm928_vm3, 0.0, %v92_v19  ;;  %723 = vmatpush3.bf16.msra.mxu1 %v720_v44  ;;  %v736_v55 = vpack.c.bf16 %v283_v54, %v282_v53  ;;  %v740_v58 = vpack.c.bf16 %v285_v57, %v284_v56  ;;  %v286_v59 = vld [vmem:[%s1067_s2 + $0x60] sm:$0xff]  ;;  %v287_v60 = vld [vmem:[%s1067_s2 + $0x68] sm:$0xff]  ;;  %v288_v62 = vld [vmem:[%s1067_s2 + $0x70] sm:$0xff] }
   0xd   :  { %713 = vmatprep.subr.bf16.mxu0 %v712_v22  ;;  %725 = vmatprep.subr.bf16.mxu1 %v724_v46  ;;  %v744_v61 = vpack.c.bf16 %v287_v60, %v286_v59  ;;  %v289_v63 = vld [vmem:[%s1067_s2 + $0x78] sm:$0xff]  ;;  %v990_v2 = vld [vmem:[%s1069_s4] sm:$0x7]  ;;  %v408_v19 = vld [vmem:[%s1068_s3 + $0x8] sm:$0xff] }
   0xe   :  { %v748_v1 = vpack.c.bf16 %v289_v63, %v288_v62  ;;  %v139_v3 = vrot.slane %v990_v2, %v138_v0  ;;  %v407_v18 = vld [vmem:[%s1068_s3] sm:$0xff]  ;;  %v410_v23 = vld [vmem:[%s1068_s3 + $0x18] sm:$0xff]  ;;  %v412_v47 = vld [vmem:[%s1068_s3 + $0x28] sm:$0xff] }
   0xf   :  { %v411_v29 = vld [vmem:[%s1068_s3 + $0x20] sm:$0xff]  ;;  %v413_v31 = vld [vmem:[%s1068_s3 + $0x30] sm:$0xff] }
  0x10   :  { %715 = vmatpush3.bf16.msra.mxu0 %v712_v22  ;;  %727 = vmatpush3.bf16.msra.mxu1 %v724_v46  ;;  %v752_v22 = vpack.c.bf16 %v408_v19, %v407_v18  ;;  %v760_v48 = vpack.c.bf16 %v412_v47, %v411_v29 }
  0x11   :  { %717 = vmatprep.subr.bf16.mxu0 %v716_v25  ;;  %729 = vmatprep.subr.bf16.mxu1 %v728_v49 }
  0x14   :  { %719 = vmatpush3.bf16.msra.mxu0 %v716_v25  ;;  %731 = vmatpush3.bf16.msra.mxu1 %v728_v49  ;;  %v414_v49 = vld [vmem:[%s1068_s3 + $0x38] sm:$0xff] }
  0x15   :  { %733 = vmatprep.subr.bf16.mxu1 %v732_v52  ;;  %753 = vmatprep.subr.bf16.mxu0 %v752_v22  ;;  %v764_v50 = vpack.c.bf16 %v414_v49, %v413_v31 }
  0x18   :  { %735 = vmatpush3.bf16.msra.mxu1 %v732_v52  ;;  %v293_v52 = vrot.slane %v990_v2, %v292_v51 }
  0x19   :  { %737 = vmatprep.subr.bf16.mxu1 %v736_v55 }
  0x1c   :  { %739 = vmatpush3.bf16.msra.mxu1 %v736_v55 }
  0x1d   :  { %741 = vmatprep.subr.bf16.mxu1 %v740_v58 }
  0x20   :  { %743 = vmatpush3.bf16.msra.mxu1 %v740_v58 }
  0x21   :  { %745 = vmatprep.subr.bf16.mxu1 %v744_v61 }
  0x24   :  { %747 = vmatpush3.bf16.msra.mxu1 %v744_v61 }
  0x25   :  { %749 = vmatprep.subr.bf16.mxu1 %v748_v1 }
  0x28   :  { %751 = vmatpush3.bf16.msra.mxu1 %v748_v1 }
  0x74   :  { %v112_v32 = vpop.permute.xlu0 %111  ;;  %v116_v33 = vpop.permute.xlu1 %115 }
  0x75   :  { %v124_v34 = vsel %vm123_vm2, %v103_v30, %v112_v32  ;;  %v126_v36 = vsel %vm123_vm2, %v105_v35, %v116_v33 }
  0x76   :  { %638 = vmatprep.mubr.msk.f32.mxu0 %vm140_vm4, %v124_v34 }
  0x78   :  { %v114_v37 = vpop.permute.xlu0 %113  ;;  %v118_v38 = vpop.permute.xlu1 %117 }
  0x79   :  { %v125_v39 = vsel %vm123_vm2, %v93_v20, %v114_v37  ;;  %v127_v40 = vsel %vm123_vm2, %v91_v21, %v118_v38  ;;  %v409_v20 = vld [vmem:[%s1068_s3 + $0x10] sm:$0xff]  ;;  %s834_s3 = smov [#allocation2]  }
  0x7a   :  { %639 = vmatmul.mubr.msk.f32.vlgmr.msra.gmra.mrb[0].mxu0 %vm140_vm4, %v125_v39  ;;  %v756_v26 = vpack.c.bf16 %v410_v23, %v409_v20  ;;  %s545_s18 = sshll.u32 %s834_s3, 4  ;;  %s546_s18 = int_to_ptr.vmem [resolvable:$true] %s545_s18 }
  0x7b   :  { %641 = vmatprep.mubr.msk.f32.mxu0 %vm140_vm4, %v126_v36  ;;  %755 = vmatpush3.bf16.msra.mxu0 %v752_v22  ;;  %s784_s19 = scalar_lea.vmem %s546_s18, 512  ;;  %p789_p1 = scmp.lt.s32.totalorder %s546_s18, %s546_s18 }
  0x7c   :  { %757 = vmatprep.subr.bf16.mxu0 %v756_v26  ;;  %p785_p0 = scmp.ne.s32.totalorder %s546_s18, %s784_s19  ;;  %p790_p2 = scmp.lt.s32.totalorder %s784_s19, %s784_s19 }
  0x7e   :  { %642 = vmatmul.mubr.msk.f32.gmra.mrb[2].mxu0 %vm140_vm4, %v127_v40  ;;  %p791_p3 = por %p790_p2, %p789_p1 }
  0x7f   :  { %759 = vmatpush3.bf16.msra.mxu0 %v756_v26 }
  0x80   :  { %761 = vmatprep.subr.bf16.mxu0 %v760_v48  ;;  %p792_p4 = pnand %p791_p3, %p785_p0 }
  0x83   :  { %763 = vmatpush3.bf16.msra.mxu0 %v760_v48 }
  0x84   :  { %765 = vmatprep.subr.bf16.mxu0 %v764_v50 }
  0x87   :  { %767 = vmatpush3.bf16.msra.mxu0 %v764_v50 }
 0x14d   :  { %v640_v4 = vpop.f32.mrb[0].mxu0 }
 0x14e   :  { %v225_v5 = vadd.f32 %v640_v4, %v139_v3  ;;  %v219_v6 = vpop.f32.mrb[1].mxu0 }
 0x14f   :  { %v220_v7 = vadd.f32 %v219_v6, %v139_v3 }
 0x150   :  { %v239_v8 = vmax.f32 %v225_v5, 0.0 }
 0x151   :  { %v238_v9 = vmax.f32 %v220_v7, 0.0  ;;  %v643_v10 = vpop.f32.mrb[2].mxu0 }
 0x152   :  { %v243_v11 = vrot.slane %v239_v8, 7  ;;  %v235_v12 = vadd.f32 %v643_v10, %v139_v3  ;;  %v229_v14 = vpop.f32.mrb[3].mxu0 }
 0x153   :  { %v242_v15 = vrot.slane %v238_v9, 7  ;;  %v230_v16 = vadd.f32 %v229_v14, %v139_v3  ;;  %v774_v17 = vpack.i.bf16 %v239_v8, %v238_v9 }
 0x154   :  { %v241_v21 = vmax.f32 %v235_v12, 0.0 }
 0x155   :  { %v240_v24 = vmax.f32 %v230_v16, 0.0  ;;  %775 = vrot.lane.b32.xlu0 %v774_v17, %s833_s10  ;;  %v248_v25 = vsel %vm90_vm0, %v242_v15, %v243_v11 }
 0x156   :  { %v245_v27 = vrot.slane %v241_v21, 7 }
 0x157   :  { %v244_v28 = vrot.slane %v240_v24, 7  ;;  %v779_v30 = vpack.i.bf16 %v241_v21, %v240_v24 }
 0x158   :  { %v249_v32 = vsel %vm90_vm0, %v245_v27, %v242_v15  ;;  %v417_v15 = vsub.s32 2, %v897_v13 }
 0x159   :  { %780 = vrot.lane.b32.xlu1 %v779_v30, %s833_s10  ;;  %387 = vrot.lane.b32.xlu0 %v220_v7, %s833_s10  ;;  %v247_v33 = vsel %vm90_vm0, %v243_v11, %v244_v28  ;;  %v246_v34 = vsel %vm90_vm0, %v244_v28, %v245_v27  ;;  %v250_v38 = vsel %vm922_vm1, 0.0, %v249_v32 }
 0x15a   :  { %v252_v44 = vsel %vm928_vm3, 0.0, %v247_v33 }
 0x15d   :  { %389 = vrot.lane.b32.xlu1 %v225_v5, %s833_s10  ;;  %391 = vrot.lane.b32.xlu0 %v230_v16, %s833_s10  ;;  %v418_v16 = vrot.slane %v990_v2, %v417_v15 }
 0x161   :  { %393 = vrot.lane.b32.xlu1 %v235_v12, %s833_s10 }
 0x1c7   :  { %v776_v35 = vpop.permute.xlu0 %775 }
 0x1c8   :  { %v778_v36 = vunpack.i.h.bf16 %v776_v35  ;;  %v777_v37 = vunpack.i.l.bf16 %v776_v35 }
 0x1ca   :  { %v270_v39 = vsel %vm140_vm4, %v250_v38, %v777_v37  ;;  %v271_v40 = vsel %vm140_vm4, %v248_v25, %v778_v36 }
 0x1cb   :  { %v781_v41 = vpop.permute.xlu1 %780  ;;  %676 = vmatprep.mubr.f32.mxu1 %v270_v39  ;;  %v388_v58 = vpop.permute.xlu0 %387 }
 0x1cc   :  { %v783_v42 = vunpack.i.h.bf16 %v781_v41  ;;  %v782_v43 = vunpack.i.l.bf16 %v781_v41  ;;  %677 = vmatmul.mubr.f32.vlgmr.msra.gmra.mrb[0].mxu1 %v271_v40 }
 0x1ce   :  { %v272_v45 = vsel %vm140_vm4, %v252_v44, %v782_v43  ;;  %v273_v46 = vsel %vm140_vm4, %v246_v34, %v783_v42 }
 0x1cf   :  { %679 = vmatprep.mubr.f32.mxu1 %v272_v45  ;;  %v390_v56 = vpop.permute.xlu1 %389  ;;  %v392_v8 = vpop.permute.xlu0 %391 }
 0x1d0   :  { %680 = vmatmul.mubr.f32.gmra.mrb[2].mxu1 %v273_v46 }
 0x1d3   :  { %v394_v5 = vpop.permute.xlu1 %393 }
 0x29f   :  { %v678_v53 = vpop.f32.mrb[0].mxu1 }
 0x2a0   :  { %v366_v54 = vadd.f32 %v678_v53, %v293_v52  ;;  %v360_v55 = vpop.f32.mrb[1].mxu1 }
 0x2a1   :  { %v361_v57 = vadd.f32 %v360_v55, %v293_v52 }
 0x2a2   :  { %v380_v59 = vmax.f32 %v366_v54, 0.0 }
 0x2a3   :  { %v379_v60 = vmax.f32 %v361_v57, 0.0  ;;  %v681_v61 = vpop.f32.mrb[2].mxu1 }
 0x2a4   :  { %v400_v62 = vadd.f32 %v390_v56, %v380_v59  ;;  %v376_v63 = vadd.f32 %v681_v61, %v293_v52  ;;  %v370_v0 = vpop.f32.mrb[3].mxu1 }
 0x2a5   :  { %v399_v1 = vadd.f32 %v388_v58, %v379_v60  ;;  %v371_v3 = vadd.f32 %v370_v0, %v293_v52 }
 0x2a6   :  { %v382_v4 = vmax.f32 %v376_v63, 0.0  ;;  %v404_v9 = vmax.f32 %v400_v62, 0.0 }
 0x2a7   :  { %v403_v6 = vmax.f32 %v399_v1, 0.0  ;;  %v381_v7 = vmax.f32 %v371_v3, 0.0 }
 0x2a8   :  { %v402_v10 = vadd.f32 %v394_v5, %v382_v4 }
 0x2a9   :  { %v401_v11 = vadd.f32 %v392_v8, %v381_v7  ;;  %698 = vmatprep.mubr.msk.f32.mxu0 %vm140_vm4, %v403_v6 }
 0x2aa   :  { %699 = vmatmul.mubr.msk.f32.vlgmr.msra.gmra.mrb[4].mxu0 %vm140_vm4, %v404_v9  ;;  %v406_v14 = vmax.f32 %v402_v10, 0.0 }
 0x2ab   :  { %v405_v12 = vmax.f32 %v401_v11, 0.0 }
 0x2ad   :  { %701 = vmatprep.mubr.msk.f32.mxu0 %vm140_vm4, %v405_v12 }
 0x2ae   :  { %702 = vmatmul.mubr.msk.f32.gmra.mrb[6].mxu0 %vm140_vm4, %v406_v14 }
 0x37d   :  { %v700_v17 = vpop.f32.mrb[4].mxu0 }
 0x37e   :  { %v503_v18 = vadd.f32 %v700_v17, %v418_v16  ;;  %v497_v19 = vpop.f32.mrb[5].mxu0 }
 0x37f   :  { %v498_v20 = vadd.f32 %v497_v19, %v418_v16 }
 0x380   :  { %517 = vst [vmem:[#allocation2 + $0x8] sm:$0xff] %v503_v18 }
 0x381   :  { %516 = vst [vmem:[#allocation2] sm:$0xff] %v498_v20  ;;  %v520_v21 = vmax.f32 %v498_v20, %v503_v18  ;;  %v703_v22 = vpop.f32.mrb[6].mxu0 }
 0x382   :  { %v513_v23 = vadd.f32 %v703_v22, %v418_v16  ;;  %v507_v24 = vpop.f32.mrb[7].mxu0 }
 0x383   :  { %v521_v25 = vrot.slane %v520_v21, 4  ;;  %v508_v26 = vadd.f32 %v507_v24, %v418_v16 }
 0x384   :  { %519 = vst [vmem:[#allocation2 + $0x18] sm:$0xff] %v513_v23 }
 0x385   :  { %v522_v27 = vmax.f32 %v520_v21, %v521_v25  ;;  %518 = vst [vmem:[#allocation2 + $0x10] sm:$0xff] %v508_v26  ;;  %v527_v13 = vmax.f32 %v508_v26, %v513_v23 }
 0x386   :  { %795 = shalt.err (!%p792_p4)
}
 0x387   :  { %s796_s21 = scalar_lea.hbm %s1070_s5, 512 }
 0x388   :  { %p797_p5 = scmp.ne.s32.totalorder %s1070_s5, %s796_s21  ;;  %p800_p6 = scmp.lt.u32.totalorder %s796_s21, %s1070_s5 }
 0x38a   :  { %p802_p7 = pnand %p800_p6, %p797_p5 }
 0x38c   :  { %805 = shalt.err (!%p802_p7)
}
 0x38d   :  { %s835_s26 = smov 128   ;;  %s836_s27 = smov 8   ;;  %v523_v2 = vrot.slane %v522_v27, 2  ;;  %v528_v28 = vrot.slane %v527_v13, 4  ;;  %vm536_vm5 = vcmask 1041409  }
 0x38e   :  { %551 = dma.vmem_to_hbm [thread:$0]  %s546_s18, 512, %s1070_s5, [#allocation3], %s835_s26, %s835_s26, %s836_s27  }
 0x38f   :  { %v524_v30 = vmax.f32 %v522_v27, %v523_v2  ;;  %v529_v32 = vmax.f32 %v527_v13, %v528_v28  ;;  %s837_s28 = smov [#allocation4]  }
 0x390   :  { %s558_s29 = sshll.u32 %s837_s28, 4  ;;  %s559_s29 = int_to_ptr.vmem [resolvable:$true] %s558_s29 }
 0x391   :  { %v530_v33 = vrot.slane %v529_v32, 2  ;;  %v525_v35 = vrot.slane %v524_v30, 1  ;;  %s806_s30 = scalar_lea.vmem %s559_s29, 32  ;;  %p811_p9 = scmp.lt.s32.totalorder %s559_s29, %s559_s29 }
 0x392   :  { %p807_p8 = scmp.ne.s32.totalorder %s559_s29, %s806_s30  ;;  %p812_p10 = scmp.lt.s32.totalorder %s806_s30, %s806_s30 }
 0x393   :  { %v531_v34 = vmax.f32 %v529_v32, %v530_v33  ;;  %v526_v37 = vmax.f32 %v524_v30, %v525_v35 }
 0x394   :  { %p813_p11 = por %p812_p10, %p811_p9 }
 0x395   :  { %v532_v36 = vrot.slane %v531_v34, 1 }
 0x396   :  { %p814_p12 = pnand %p813_p11, %p807_p8 }
 0x397   :  { %v533_v38 = vmax.f32 %v531_v34, %v532_v36 }
 0x399   :  { %v537_v39 = vsel %vm536_vm5, %v533_v38, %v526_v37 }
 0x39a   :  { %539 = vst [vmem:[#allocation4] sm:$0x3] %v537_v39 }
 0x39b   :  { %817 = shalt.err (!%p814_p12)
}
 0x39c   :  { %s818_s8 = scalar_lea.hbm %s1071_s6, 32 }
 0x39d   :  { %p819_p13 = scmp.ne.s32.totalorder %s1071_s6, %s818_s8  ;;  %p822_p0 = scmp.lt.u32.totalorder %s818_s8, %s1071_s6 }
 0x39f   :  { %p824_p1 = pnand %p822_p0, %p819_p13 }
 0x3a1   :  { %827 = shalt.err (!%p824_p1)
}
 0x3a2   :  { %561 = dma.vmem_to_hbm [thread:$0]  %s559_s29, 32, %s1071_s6, [#allocation5]  }
 0x3a3   :  { %828 = dma.done.wait [#allocation3], 512  }
 0x3a4   :  { %829 = vsyncadd [#allocation3], 4294966784 }
 0x3a5   :  { %830 = dma.done.wait [#allocation5], 32  }
 0x3a6   :  { %831 = vsyncadd [#allocation5], 4294967264 }
 0x3a7   :  { %568 = vsyncpa [#allocation3], 1 }
 0x3a8   :  { %569 = vsyncpa [#allocation5], 1 }

</bundles_post_ra>
